<compile_context>
chip_gen: v6e
topology: v6e:2x2x1
jax: 0.10.0
libtpu: 0.0.40
codegen_flags: <defaults>
</compile_context>

<pallas_src>
import math

import jax
import jax.numpy as jnp
from jax.experimental import pallas as pl
from jax.experimental.pallas import tpu as pltpu

_LOG_SCALE = -math.log(10000.0) / 16.0
_HALF_PI = math.pi / 2.0


def _pos_enc_kernel(p_ref, out_ref):
    # p_ref:   [T, 8]   two original rows packed per kernel row:
    #          (h0, r0, th0, phi0, h1, r1, th1, phi1)
    # out_ref: [T, 128] = (pe_x0, pe_y0, pe_z0, pe_phi0, pe_x1, ..., pe_phi1)
    p = p_ref[...]

    # sin/cos over the whole 8-lane tile (only the theta lanes are consumed,
    # but this costs no more EUP vreg pushes than two skinny [T,1] calls).
    cos_p = jnp.cos(p)
    sin_p = jnp.sin(p)

    lane = jax.lax.broadcasted_iota(jnp.int32, (1, 16), 1)
    # freq[k] = div_term[k // 2] = exp((k - k % 2) * (-ln(1e4)/16))
    freq = jnp.exp((lane - lane % 2).astype(jnp.float32) * _LOG_SCALE)   # [1, 16]
    # phase: 0 on even lanes (sin), pi/2 on odd lanes (cos == sin(. + pi/2)).
    phase = (lane % 2).astype(jnp.float32) * _HALF_PI                    # [1, 16]

    args = []
    for o in (0, 4):                      # the two packed original rows
        h = p[:, o + 0:o + 1]
        r = p[:, o + 1:o + 2]
        phi = p[:, o + 3:o + 4]
        x = r * cos_p[:, o + 2:o + 3]
        y = r * sin_p[:, o + 2:o + 3]
        for v in (x, y, h, phi):
            args.append(v * freq + phase)                                # [T, 16]

    # Single lane-dense 128-wide store.
    out_ref[...] = jnp.sin(jnp.concatenate(args, axis=-1))


def _round_up(x, m):
    return ((x + m - 1) // m) * m


def positional_encoder_pallas(params, *, max_tile_rows=2048):
    """Pallas path. params: [N, 4] -> [N, 64] float32."""
    params = jnp.asarray(params, jnp.float32)
    n = params.shape[0]
    assert params.shape[-1] == 4

    m = _round_up(n, 2) // 2              # packed rows (2 original rows each)
    if m <= 16:
        tile = _round_up(m, 8)            # one tiny block
    elif m <= 2 * max_tile_rows:
        tile = _round_up(-(-m // 2), 8)   # 2 blocks -> both v7x TCs get work
    else:
        tile = max_tile_rows              # ~1 MiB f32 output block per step
    m_pad = _round_up(m, tile)

    pad_rows = 2 * m_pad - n              # even-ness + tile padding (discarded)
    if pad_rows:
        params = jnp.pad(params, ((0, pad_rows), (0, 0)))
    packed = params.reshape(m_pad, 8)     # row-major: row 2i then row 2i+1

    out = pl.pallas_call(
        _pos_enc_kernel,
        out_shape=jax.ShapeDtypeStruct((m_pad, 128), jnp.float32),
        grid_spec=pl.GridSpec(
            grid=(m_pad // tile,),
            in_specs=[pl.BlockSpec((tile, 8), lambda i: (i, 0))],
            out_specs=pl.BlockSpec((tile, 128), lambda i: (i, 0)),
        ),
        compiler_params=pltpu.CompilerParams(
            dimension_semantics=("parallel",)),
    )(packed)

    return out.reshape(2 * m_pad, 64)[:n]


def _reference(params):
    """Pure-JAX reference mirroring the PyTorch forward exactly."""
    params = jnp.asarray(params, jnp.float32)
    h, r, theta, phi = (params[:, i] for i in range(4))
    x = r * jnp.cos(theta)
    y = r * jnp.sin(theta)
    z = h
    div_term = jnp.exp(jnp.arange(0, 16, 2, dtype=jnp.float32) * _LOG_SCALE)

    def pe(v):
        a = v[:, None] * div_term[None, :]
        out = jnp.zeros((params.shape[0], 16), jnp.float32)
        out = out.at[:, 0::2].set(jnp.sin(a))
        out = out.at[:, 1::2].set(jnp.cos(a))
        return out

    return jnp.concatenate([pe(x), pe(y), pe(z), pe(phi)], axis=-1)


_SMALL_N = 512


def positional_encoder(params):
    """PositionalEncoder.forward: [N, 4] -> [N, 64].

    Tiny N: fused pure-JAX (pallas_call launch/DMA setup would dominate).
    Large N: lane-dense tiled Pallas kernel.
    """
    params = jnp.asarray(params, jnp.float32)
    if params.shape[0] < _SMALL_N:
        return _reference(params)
    return positional_encoder_pallas(params)


if __name__ == "__main__":
    key = jax.random.PRNGKey(0)
    batch, num_cameras = 2, 8
    n = batch * num_cameras
    # params: [batch*num_cameras, 4] = (h, r, theta, phi)
    params = jax.random.normal(key, (n, 4), dtype=jnp.float32)

    # Exercise the Pallas kernel at the module's demo shape.
    out = jax.block_until_ready(positional_encoder_pallas(params))
    ref = _reference(params)
    assert out.shape == (n, 64) and out.dtype == jnp.float32
    assert jnp.allclose(out, ref, atol=1e-5, rtol=1e-5)

    # Exercise the large-N path: odd row count, padding, 2-block grid.
    params_big = jax.random.normal(jax.random.PRNGKey(1), (5999, 4), jnp.float32)
    out_big = jax.block_until_ready(positional_encoder_pallas(params_big))
    assert out_big.shape == (5999, 64)
    assert jnp.allclose(out_big, _reference(params_big), atol=1e-5, rtol=1e-5)

    # Dispatcher sanity (small N takes the fused pure-JAX path).
    out_disp = jax.block_until_ready(positional_encoder(params))
    assert jnp.allclose(out_disp, ref, atol=1e-5, rtol=1e-5)

    print("KERNEL_OK")
</pallas_src>

<mosaic_0001>
module attributes {stable_mosaic.version = 11 : i64} {
  func.func @_pos_enc_kernel(%arg0: i32, %arg1: memref<8x8xf32, #tpu.memory_space<vmem>>, %arg2: memref<8x128xf32, #tpu.memory_space<vmem>>) attributes {dimension_semantics = [#tpu.dimension_semantics<parallel>], iteration_bounds = array<i64: 1>, scalar_prefetch = 0 : i64, scratch_operands = 0 : i64, tpu.core_type = #tpu.core_type<tc>, window_params = [{transform_indices = @transform_0, window_bounds = array<i64: 8, 8>}, {transform_indices = @transform_1, window_bounds = array<i64: 8, 128>}]} {
    %c0 = arith.constant 0 : index
    %c0_0 = arith.constant 0 : index
    %0 = vector.load %arg1[%c0, %c0_0] : memref<8x8xf32, #tpu.memory_space<vmem>>, vector<8x8xf32>
    %1 = math.cos %0 : vector<8x8xf32>
    %2 = math.sin %0 : vector<8x8xf32>
    %3 = tpu.iota {dimensions = array<i32: 1>} : vector<1x16xi32>
    %c2_i32 = arith.constant 2 : i32
    %c0_i32 = arith.constant 0 : i32
    %4 = arith.cmpi eq, %c2_i32, %c0_i32 : i32
    %c1_i32 = arith.constant 1 : i32
    %5 = arith.select %4, %c1_i32, %c2_i32 : i32
    %6 = vector.broadcast %5 : i32 to vector<1x16xi32>
    %7 = arith.remsi %3, %6 : vector<1x16xi32>
    %c0_i32_1 = arith.constant 0 : i32
    %8 = vector.broadcast %c0_i32_1 : i32 to vector<1x16xi32>
    %9 = arith.cmpi ne, %7, %8 : vector<1x16xi32>
    %c0_i32_2 = arith.constant 0 : i32
    %10 = vector.broadcast %c0_i32_2 : i32 to vector<1x16xi32>
    %11 = arith.cmpi slt, %7, %10 : vector<1x16xi32>
    %c0_i32_3 = arith.constant 0 : i32
    %12 = arith.cmpi slt, %5, %c0_i32_3 : i32
    %13 = vector.broadcast %12 : i1 to vector<1x16xi1>
    %14 = vector.broadcast %13 : vector<1x16xi1> to vector<1x16xi1>
    %15 = arith.xori %11, %14 : vector<1x16xi1>
    %16 = arith.andi %15, %9 : vector<1x16xi1>
    %17 = vector.broadcast %5 : i32 to vector<1x16xi32>
    %18 = arith.addi %7, %17 : vector<1x16xi32>
    %19 = arith.select %16, %18, %7 : vector<1x16xi1>, vector<1x16xi32>
    %20 = arith.subi %3, %19 : vector<1x16xi32>
    %21 = arith.sitofp %20 : vector<1x16xi32> to vector<1x16xf32>
    %cst = arith.constant -0.575646281 : f32
    %22 = vector.broadcast %cst : f32 to vector<1x16xf32>
    %23 = arith.mulf %21, %22 : vector<1x16xf32>
    %24 = math.exp %23 : vector<1x16xf32>
    %c2_i32_4 = arith.constant 2 : i32
    %c0_i32_5 = arith.constant 0 : i32
    %25 = arith.cmpi eq, %c2_i32_4, %c0_i32_5 : i32
    %c1_i32_6 = arith.constant 1 : i32
    %26 = arith.select %25, %c1_i32_6, %c2_i32_4 : i32
    %27 = vector.broadcast %26 : i32 to vector<1x16xi32>
    %28 = arith.remsi %3, %27 : vector<1x16xi32>
    %c0_i32_7 = arith.constant 0 : i32
    %29 = vector.broadcast %c0_i32_7 : i32 to vector<1x16xi32>
    %30 = arith.cmpi ne, %28, %29 : vector<1x16xi32>
    %c0_i32_8 = arith.constant 0 : i32
    %31 = vector.broadcast %c0_i32_8 : i32 to vector<1x16xi32>
    %32 = arith.cmpi slt, %28, %31 : vector<1x16xi32>
    %c0_i32_9 = arith.constant 0 : i32
    %33 = arith.cmpi slt, %26, %c0_i32_9 : i32
    %34 = vector.broadcast %33 : i1 to vector<1x16xi1>
    %35 = vector.broadcast %34 : vector<1x16xi1> to vector<1x16xi1>
    %36 = arith.xori %32, %35 : vector<1x16xi1>
    %37 = arith.andi %36, %30 : vector<1x16xi1>
    %38 = vector.broadcast %26 : i32 to vector<1x16xi32>
    %39 = arith.addi %28, %38 : vector<1x16xi32>
    %40 = arith.select %37, %39, %28 : vector<1x16xi1>, vector<1x16xi32>
    %41 = arith.sitofp %40 : vector<1x16xi32> to vector<1x16xf32>
    %cst_10 = arith.constant 1.57079637 : f32
    %42 = vector.broadcast %cst_10 : f32 to vector<1x16xf32>
    %43 = arith.mulf %41, %42 : vector<1x16xf32>
    %44 = vector.extract_strided_slice %0 {offsets = [0, 0], sizes = [8, 1], strides = [1, 1]} : vector<8x8xf32> to vector<8x1xf32>
    %45 = vector.extract_strided_slice %0 {offsets = [0, 1], sizes = [8, 1], strides = [1, 1]} : vector<8x8xf32> to vector<8x1xf32>
    %46 = vector.extract_strided_slice %0 {offsets = [0, 3], sizes = [8, 1], strides = [1, 1]} : vector<8x8xf32> to vector<8x1xf32>
    %47 = vector.extract_strided_slice %1 {offsets = [0, 2], sizes = [8, 1], strides = [1, 1]} : vector<8x8xf32> to vector<8x1xf32>
    %48 = arith.mulf %45, %47 : vector<8x1xf32>
    %49 = vector.extract_strided_slice %2 {offsets = [0, 2], sizes = [8, 1], strides = [1, 1]} : vector<8x8xf32> to vector<8x1xf32>
    %50 = arith.mulf %45, %49 : vector<8x1xf32>
    %51 = vector.broadcast %48 : vector<8x1xf32> to vector<8x16xf32>
    %52 = vector.broadcast %24 : vector<1x16xf32> to vector<8x16xf32>
    %53 = arith.mulf %51, %52 : vector<8x16xf32>
    %54 = vector.broadcast %43 : vector<1x16xf32> to vector<8x16xf32>
    %55 = arith.addf %53, %54 : vector<8x16xf32>
    %56 = vector.broadcast %50 : vector<8x1xf32> to vector<8x16xf32>
    %57 = vector.broadcast %24 : vector<1x16xf32> to vector<8x16xf32>
    %58 = arith.mulf %56, %57 : vector<8x16xf32>
    %59 = vector.broadcast %43 : vector<1x16xf32> to vector<8x16xf32>
    %60 = arith.addf %58, %59 : vector<8x16xf32>
    %61 = vector.broadcast %44 : vector<8x1xf32> to vector<8x16xf32>
    %62 = vector.broadcast %24 : vector<1x16xf32> to vector<8x16xf32>
    %63 = arith.mulf %61, %62 : vector<8x16xf32>
    %64 = vector.broadcast %43 : vector<1x16xf32> to vector<8x16xf32>
    %65 = arith.addf %63, %64 : vector<8x16xf32>
    %66 = vector.broadcast %46 : vector<8x1xf32> to vector<8x16xf32>
    %67 = vector.broadcast %24 : vector<1x16xf32> to vector<8x16xf32>
    %68 = arith.mulf %66, %67 : vector<8x16xf32>
    %69 = vector.broadcast %43 : vector<1x16xf32> to vector<8x16xf32>
    %70 = arith.addf %68, %69 : vector<8x16xf32>
    %71 = vector.extract_strided_slice %0 {offsets = [0, 4], sizes = [8, 1], strides = [1, 1]} : vector<8x8xf32> to vector<8x1xf32>
    %72 = vector.extract_strided_slice %0 {offsets = [0, 5], sizes = [8, 1], strides = [1, 1]} : vector<8x8xf32> to vector<8x1xf32>
    %73 = vector.extract_strided_slice %0 {offsets = [0, 7], sizes = [8, 1], strides = [1, 1]} : vector<8x8xf32> to vector<8x1xf32>
    %74 = vector.extract_strided_slice %1 {offsets = [0, 6], sizes = [8, 1], strides = [1, 1]} : vector<8x8xf32> to vector<8x1xf32>
    %75 = arith.mulf %72, %74 : vector<8x1xf32>
    %76 = vector.extract_strided_slice %2 {offsets = [0, 6], sizes = [8, 1], strides = [1, 1]} : vector<8x8xf32> to vector<8x1xf32>
    %77 = arith.mulf %72, %76 : vector<8x1xf32>
    %78 = vector.broadcast %75 : vector<8x1xf32> to vector<8x16xf32>
    %79 = vector.broadcast %24 : vector<1x16xf32> to vector<8x16xf32>
    %80 = arith.mulf %78, %79 : vector<8x16xf32>
    %81 = vector.broadcast %43 : vector<1x16xf32> to vector<8x16xf32>
    %82 = arith.addf %80, %81 : vector<8x16xf32>
    %83 = vector.broadcast %77 : vector<8x1xf32> to vector<8x16xf32>
    %84 = vector.broadcast %24 : vector<1x16xf32> to vector<8x16xf32>
    %85 = arith.mulf %83, %84 : vector<8x16xf32>
    %86 = vector.broadcast %43 : vector<1x16xf32> to vector<8x16xf32>
    %87 = arith.addf %85, %86 : vector<8x16xf32>
    %88 = vector.broadcast %71 : vector<8x1xf32> to vector<8x16xf32>
    %89 = vector.broadcast %24 : vector<1x16xf32> to vector<8x16xf32>
    %90 = arith.mulf %88, %89 : vector<8x16xf32>
    %91 = vector.broadcast %43 : vector<1x16xf32> to vector<8x16xf32>
    %92 = arith.addf %90, %91 : vector<8x16xf32>
    %93 = vector.broadcast %73 : vector<8x1xf32> to vector<8x16xf32>
    %94 = vector.broadcast %24 : vector<1x16xf32> to vector<8x16xf32>
    %95 = arith.mulf %93, %94 : vector<8x16xf32>
    %96 = vector.broadcast %43 : vector<1x16xf32> to vector<8x16xf32>
    %97 = arith.addf %95, %96 : vector<8x16xf32>
    %98 = tpu.concatenate %55, %60, %65, %70, %82, %87, %92, %97 in 1 : vector<8x16xf32>, vector<8x16xf32>, vector<8x16xf32>, vector<8x16xf32>, vector<8x16xf32>, vector<8x16xf32>, vector<8x16xf32>, vector<8x16xf32> -> vector<8x128xf32>
    %99 = math.sin %98 : vector<8x128xf32>
    %c0_11 = arith.constant 0 : index
    %c0_12 = arith.constant 0 : index
    %100 = vector.load %arg2[%c0_11, %c0_12] : memref<8x128xf32, #tpu.memory_space<vmem>>, vector<8x128xf32>
    tpu.vector_store %arg2[%c0_11, %c0_12], %99 {strides = array<i32>} : memref<8x128xf32, #tpu.memory_space<vmem>>, vector<8x128xf32>,
    return
  }
  func.func @transform_0(%arg0: i32) -> (i32, i32) {
    %c0_i32 = arith.constant 0 : i32
    %c0_i32_0 = arith.constant 0 : i32
    return %arg0, %c0_i32 : i32, i32
  }
  func.func @transform_1(%arg0: i32) -> (i32, i32) {
    %c0_i32 = arith.constant 0 : i32
    %c0_i32_0 = arith.constant 0 : i32
    return %arg0, %c0_i32 : i32, i32
  }
}

</mosaic_0001>

<bundles_post_ra>
// kernel: tpu_custom_call.1
= control target key start
LH: loop header
LB: loop body
LE: loop exit
PB: predicated region body
PF: predicated region fallthrough
CT: control target
= control target key end

     0   :  { %6 = vsyncpa [#allocation3], 0  ;;  %s685_s0 = inlined_call_operand.hbm [shape: f32[8,8], index: 0, kind: input, shape index: {}]   ;;  %s686_s1 = inlined_call_operand.hbm [shape: f32[8,128], index: 1, kind: output, shape index: {}]  }
   0x1   :  { %7 = vsyncpa [#allocation4], 0  ;;  %s577_s6 = smov [#allocation2]  }
   0x2   :  { %s14_s7 = sshll.u32 %s577_s6, 4  ;;  %s15_s7 = int_to_ptr.vmem [resolvable:$true] %s14_s7 }
   0x3   :  { %s541_s8 = scalar_lea.vmem %s15_s7, 128  ;;  %p546_p1 = scmp.lt.s32.totalorder %s15_s7, %s15_s7 }
   0x4   :  { %p542_p0 = scmp.ne.s32.totalorder %s15_s7, %s541_s8  ;;  %p547_p2 = scmp.lt.s32.totalorder %s541_s8, %s541_s8 }
   0x6   :  { %p548_p3 = por %p547_p2, %p546_p1 }
   0x8   :  { %p549_p4 = pnand %p548_p3, %p542_p0 }
   0xa   :  { %552 = shalt.err (!%p549_p4)
}
   0xb   :  { %17 = dma.hbm_to_vmem [thread:$0]  %s685_s0, 128, %s15_s7, [#allocation3]  }
   0xc   :  { %573 = dma.done.wait [#allocation3], 128  }
   0xd   :  { %574 = vsyncadd [#allocation3], 4294967168  ;;  %v578_v0 = vmov 0   ;;  %v579_v1 = vmov 3   ;;  %v612_v2 = vld [vmem:[#allocation2] sm:$0xff]  ;;  %s587_s0 = smov 127  }
   0xe   :  { %515 = vset.pattern.permute.xlu1 %v578_v0  ;;  %516 = vset.pattern.permute.xlu0 %v579_v1  ;;  %v25_v3 = vand.u32 2139095040, %v612_v2  ;;  %v22_v5 = vand.u32 2147483647, %v612_v2  ;;  %v580_v14 = vmov 683565275   ;;  %vm24_vm7 = vcmp.lt.s32.totalorder %v612_v2, 0 }
   0xf   :  { %276 = vperm.xlu1 %515, %v612_v2   ;;  %v581_v16 = vmov 2475754826   ;;  %v582_v18 = vmov 2131351028   ;;  %v583_v20 = vmov 2102212464   ;;  %vm114_vm15 = vweird.f32 %v612_v2 }
  0x10   :  { %v26_v4 = vshrl.u32 %v25_v3, 23  ;;  %v29_v8 = vand.u32 8388607, %v22_v5  ;;  %v584_v22 = vmov 920167782   ;;  %s591_s11 = smov 48  }
  0x11   :  { %v585_v29 = vmov 1326507024   ;;  %vm23_vm8 = vcmp.le.f32.partialorder %v22_v5, 0.7853982  ;;  %s592_s12 = smov 32   ;;  %s593_s13 = smov 16  }
  0x12   :  { %v473_v6 = vadd.s32 4294967169, %v26_v4  ;;  %v30_v11 = vor.u32 8388608, %v29_v8  ;;  %s594_s14 = smov 64   ;;  %s595_s15 = smov 80  }
  0x13   :  { %s596_s16 = smov 96   ;;  %s597_s17 = smov 112  }
  0x14   :  { %v32_v7 = vadd.s32 1, %v473_v6  ;;  %v70_v31 = vshll.u32 %v30_v11, 8  ;;  %s598_s18 = smov [#allocation5]  }
  0x15   :  { %s464_s19 = sshll.u32 %s598_s18, 4  ;;  %s465_s19 = int_to_ptr.vmem [resolvable:$true] %s464_s19 }
  0x16   :  { %vm33_vm0 = vcmp.gt.s32.totalorder %v32_v7, 0  ;;  %s553_s20 = scalar_lea.vmem %s465_s19, 128  ;;  %p558_p6 = scmp.lt.s32.totalorder %s465_s19, %s465_s19 }
  0x17   :  { %v34_v9 = vsel %vm33_vm0, %v32_v7, 0  ;;  %vm339_vm0 = vcmask 130048   ;;  %p554_p5 = scmp.ne.s32.totalorder %s465_s19, %s553_s20  ;;  %p559_p7 = scmp.lt.s32.totalorder %s553_s20, %s553_s20 }
  0x18   :  { %v36_v10 = vand.u32 31, %v34_v9  ;;  %v35_v12 = vshrl.u32 %v34_v9, 5 }
  0x19   :  { %p560_p8 = por %p559_p7, %p558_p6 }
  0x1a   :  { %v37_v13 = vsub.s32 32, %v36_v10  ;;  %v39_v15 = vshll.u32 %v580_v14, %v36_v10  ;;  %v42_v17 = vshll.u32 %v581_v16, %v36_v10  ;;  %v45_v19 = vshll.u32 %v582_v18, %v36_v10 }
  0x1b   :  { %v48_v21 = vshll.u32 %v583_v20, %v36_v10  ;;  %v51_v23 = vshll.u32 %v584_v22, %v36_v10  ;;  %vm54_vm1 = vcmp.lt.s32.totalorder %v35_v12, 1  ;;  %vm57_vm2 = vcmp.lt.s32.totalorder %v35_v12, 4  ;;  %p561_p9 = pnand %p560_p8, %p554_p5 }
  0x1c   :  { %v38_v24 = vshrl.u32 %v580_v14, %v37_v13  ;;  %v40_v25 = vshrl.u32 %v581_v16, %v37_v13  ;;  %v43_v26 = vshrl.u32 %v582_v18, %v37_v13  ;;  %v46_v27 = vshrl.u32 %v583_v20, %v37_v13 }
  0x1d   :  { %v49_v28 = vshrl.u32 %v584_v22, %v37_v13  ;;  %v52_v30 = vshrl.u32 %v585_v29, %v37_v13  ;;  %vm55_vm3 = vcmp.lt.s32.totalorder %v35_v12, 2  ;;  %vm56_vm4 = vcmp.lt.s32.totalorder %v35_v12, 3 }
  0x1e   :  { %v41_v32 = vor.u32 %v40_v25, %v39_v15  ;;  %v44_v33 = vor.u32 %v43_v26, %v42_v17  ;;  %v47_v34 = vor.u32 %v46_v27, %v45_v19 }
  0x1f   :  { %v50_v35 = vor.u32 %v49_v28, %v48_v21  ;;  %v53_v36 = vor.u32 %v52_v30, %v51_v23  ;;  %v586_v28 = vmov 1  }
  0x20   :  { %v58_v37 = vsel %vm54_vm1, %v38_v24, %v41_v32  ;;  %v59_v38 = vsel %vm57_vm2, %v47_v34, 2102212464  ;;  %v62_v39 = vsel %vm54_vm1, %v41_v32, %v44_v33  ;;  %v66_v40 = vsel %vm54_vm1, %v44_v33, %v47_v34  ;;  %518 = vset.pattern.permute.xlu1 %v586_v28 }
  0x21   :  { %v60_v41 = vsel %vm56_vm4, %v44_v33, %v59_v38  ;;  %v63_v42 = vsel %vm57_vm2, %v50_v35, 920167782  ;;  %v67_v43 = vsel %vm57_vm2, %v53_v36, 1326507024  ;;  %vm341_vm1 = vcmask 261120  }
  0x22   :  { %v64_v44 = vsel %vm56_vm4, %v47_v34, %v63_v42  ;;  %v68_v45 = vsel %vm56_vm4, %v50_v35, %v67_v43  ;;  %v61_v46 = vsel %vm55_vm3, %v58_v37, %v60_v41  ;;  %v588_v43 = vmov 4  }
  0x23   :  { %v65_v47 = vsel %vm55_vm3, %v62_v39, %v64_v44  ;;  %v69_v48 = vsel %vm55_vm3, %v66_v40, %v68_v45  ;;  %v77_v53 = vmul.u32 %v70_v31, %v61_v46  ;;  %v589_v44 = vmov 7  }
  0x24   :  { %v630_v49 = vmul.u32.u64.low %v70_v31, %v69_v48  ;;  %v631_v50 = vmul.u32.u64.high %v70_v31, %v69_v48, %v630_v49  ;;  %v633_v51 = vmul.u32.u64.low %v70_v31, %v65_v47  ;;  %v634_v52 = vmul.u32.u64.high %v70_v31, %v65_v47, %v633_v51 }
  0x25   :  { %v229_v45 = vlaneseq  ;;  %vm343_vm2 = vcmask 392192   ;;  %vm345_vm3 = vcmask 523264   ;;  %vm347_vm4 = vcmask 654336  }
  0x26   :  { %vm79_vm5 = vc.u32 %v631_v50, %v633_v51  ;;  %v80_v54 = vadd.s32 1, %v634_v52  ;;  %v78_v1 = vadd.s32 %v633_v51, %v631_v50 }
  0x27   :  { %v230_v46 = vand.u32 127, %v229_v45 }
  0x28   :  { %v81_v55 = vsel %vm79_vm5, %v80_v54, %v634_v52  ;;  %vm349_vm5 = vcmask 785408  }
  0x29   :  { %v82_v56 = vadd.s32 %v81_v55, %v77_v53  ;;  %v235_v47 = vand.u32 1, %v230_v46 }
  0x2b   :  { %v83_v57 = vadd.s32 536870912, %v82_v56  ;;  %v243_v48 = vsub.s32 %v230_v46, %v235_v47 }
  0x2d   :  { %v84_v58 = vshrl.u32 %v83_v57, 30  ;;  %v244_v49 = vcvt.s32.f32 %v243_v48  ;;  %v248_v57 = vcvt.s32.f32 %v235_v47 }
  0x2f   :  { %v85_v59 = vshll.u32 %v84_v58, 30  ;;  %v108_v19 = vsub.s32 4, %v84_v58  ;;  %v245_v50 = vmul.f32 -0.5756463, %v244_v49 }
  0x31   :  { %v86_v60 = vsub.s32 %v82_v56, %v85_v59  ;;  %v109_v24 = vsel %vm24_vm7, %v108_v19, %v84_v58  ;;  %v246_v51 = vmul.f32 1.442695, %v245_v50  ;;  %v590_v56 = vmov 5  }
  0x32   :  { %v111_v26 = vsel %vm23_vm8, 0, %v109_v24 }
  0x33   :  { %v88_v61 = vsub.s32 0, %v86_v60  ;;  %v218_v27 = vadd.s32 3, %v111_v26  ;;  %v115_v31 = vand.u32 3, %v111_v26 }
  0x35   :  { %v474_v62 = vmin.u32 %v88_v61, %v86_v60  ;;  %v219_v30 = vand.u32 3, %v218_v27  ;;  %vm120_vm10 = vcmp.eq.s32.totalorder %v115_v31, 2  ;;  %vm117_vm12 = vcmp.eq.s32.totalorder %v115_v31, 0 }
  0x36   :  { %vm116_vm14 = vcmp.lt.s32.totalorder %v115_v31, 2 }
  0x37   :  { %v90_v63 = vclz %v474_v62  ;;  %vm224_vm9 = vcmp.eq.s32.totalorder %v219_v30, 2  ;;  %vm221_vm11 = vcmp.eq.s32.totalorder %v219_v30, 0  ;;  %vm220_vm13 = vcmp.lt.s32.totalorder %v219_v30, 2 }
  0x39   :  { %v475_v0 = vadd.s32 4294967294, %v90_v63 }
  0x3b   :  { %vm476_vm6 = vcmp.lt.s32.totalorder %v475_v0, 0 }
  0x3c   :  { %v93_v3 = vsel %vm476_vm6, 0, %v475_v0  ;;  %vm351_vm6 = vcmask 916480  }
  0x3d   :  { %v94_v4 = vsub.s32 32, %v93_v3  ;;  %v95_v6 = vshll.u32 %v86_v60, %v93_v3  ;;  %v98_v7 = vsub.s32 4294967266, %v93_v3  ;;  %v249_v60 = vmul.f32 1.5707964, %v248_v57 }
  0x3f   :  { %v96_v8 = vshrl.u32 %v78_v1, %v94_v4  ;;  %v99_v9 = vadd.s32 127, %v98_v7 }
  0x41   :  { %v97_v10 = vor.u32 %v96_v8, %v95_v6  ;;  %v100_v11 = vshll.u32 %v99_v9, 23 }
  0x43   :  { %v101_v12 = vor.u32 4788187, %v100_v11  ;;  %v104_v13 = vcvt.s32.f32 %v97_v10 }
  0x45   :  { %v102_v15 = vand.u32 2147483647, %v101_v12 }
  0x47   :  { %v105_v17 = vmul.f32 %v104_v13, %v102_v15 }
  0x49   :  { %v106_v21 = vxor.u32 2147483648, %v105_v17 }
  0x4b   :  { %v107_v23 = vsel %vm24_vm7, %v106_v21, %v105_v17 }
  0x4c   :  { %v110_v25 = vsel %vm23_vm8, %v612_v2, %v107_v23 }
  0x4d   :  { %523 = vcosq.f32 %v110_v25 }
  0x4e   :  { %525 = vsinq.f32 %v110_v25 }
  0x4f   :  { %527 = vpow2.f32 %v246_v51 }
  0x5a   :  { %v524_v32 = vpop.eup %523 }
  0x5b   :  { %v526_v33 = vpop.eup %525  ;;  %v121_v34 = vxor.u32 2147483648, %v524_v32 }
  0x5c   :  { %v118_v5 = vxor.u32 2147483648, %v526_v33  ;;  %v528_v58 = vpop.eup %527 }
  0x5d   :  { %v226_v35 = vsel %vm224_vm9, %v121_v34, %v526_v33  ;;  %v122_v36 = vsel %vm120_vm10, %v121_v34, %v526_v33 }
  0x5e   :  { %v223_v37 = vsel %vm221_vm11, %v524_v32, %v118_v5  ;;  %v119_v38 = vsel %vm117_vm12, %v524_v32, %v118_v5 }
  0x5f   :  { %v227_v39 = vsel %vm220_vm13, %v223_v37, %v226_v35  ;;  %v123_v40 = vsel %vm116_vm14, %v119_v38, %v122_v36 }
  0x60   :  { %v228_v41 = vsel %vm114_vm15, nan, %v227_v39  ;;  %v124_v42 = vsel %vm114_vm15, nan, %v123_v40 }
  0x61   :  { %256 = vrot.lane.b32.xlu0 %v228_v41, %s587_s0 }
  0x65   :  { %251 = vrot.lane.b32.xlu0 %v124_v42, %s587_s0 }
  0x69   :  { %282 = vperm.xlu0 %516, %v612_v2  }
  0x6d   :  { %517 = vset.pattern.permute.xlu0 %v588_v43 }
  0x6e   :  { %300 = vperm.xlu0 %517, %v612_v2  }
  0x72   :  { %522 = vset.pattern.permute.xlu0 %v589_v44 }
  0x8a   :  { %v277_v59 = vpop.permute.xlu1 %276 }
  0x8b   :  { %v279_v62 = vmul.f32 %v528_v58, %v277_v59 }
  0x8d   :  { %v280_v1 = vadd.f32 %v279_v62, %v249_v60 }
  0xd3   :  { %v257_v52 = vpop.permute.xlu0 %256 }
  0xd4   :  { %v259_v53 = vmul.f32 %v257_v52, %v612_v2 }
  0xd6   :  { %269 = vperm.xlu1 %518, %v259_v53  }
  0xd7   :  { %v252_v54 = vpop.permute.xlu0 %251 }
  0xd8   :  { %v254_v55 = vmul.f32 %v252_v54, %v612_v2 }
  0xda   :  { %519 = vset.pattern.permute.xlu1 %v590_v56 }
  0xdb   :  { %288 = vperm.xlu1 %519, %v254_v55  }
  0xdf   :  { %294 = vperm.xlu1 %519, %v259_v53  }
  0xe3   :  { %520 = vset.pattern.permute.xlu1 %v589_v44 }
  0xe4   :  { %306 = vperm.xlu1 %520, %v612_v2   ;;  %v283_v61 = vpop.permute.xlu0 %282 }
  0xe5   :  { %v285_v63 = vmul.f32 %v528_v58, %v283_v61 }
  0xe7   :  { %v286_v0 = vadd.f32 %v285_v63, %v249_v60 }
  0xe8   :  { %521 = vset.pattern.permute.xlu1 %v586_v28 }
  0xe9   :  { %262 = vperm.xlu1 %521, %v254_v55   ;;  %320 = vrot.lane.b32.xlu0 %v286_v0, %s591_s11  ;;  %v301_v7 = vpop.permute.xlu0 %300 }
  0xea   :  { %v303_v2 = vmul.f32 %v528_v58, %v301_v7 }
  0xec   :  { %v304_v13 = vadd.f32 %v303_v2, %v249_v60 }
  0xed   :  { %316 = vrot.lane.b32.xlu1 %v280_v1, %s592_s12 }
 0x151   :  { %v270_v3 = vpop.permute.xlu1 %269 }
 0x152   :  { %v272_v4 = vmul.f32 %v528_v58, %v270_v3 }
 0x154   :  { %v273_v6 = vadd.f32 %v272_v4, %v249_v60 }
 0x156   :  { %v289_v8 = vpop.permute.xlu1 %288  ;;  %312 = vrot.lane.b32.xlu0 %v273_v6, %s593_s13 }
 0x157   :  { %v291_v9 = vmul.f32 %v528_v58, %v289_v8 }
 0x159   :  { %v292_v10 = vadd.f32 %v291_v9, %v249_v60 }
 0x15a   :  { %v295_v11 = vpop.permute.xlu1 %294 }
 0x15b   :  { %v297_v12 = vmul.f32 %v528_v58, %v295_v11  ;;  %324 = vrot.lane.b32.xlu1 %v292_v10, %s594_s14  ;;  %v321_v24 = vpop.permute.xlu0 %320 }
 0x15d   :  { %v298_v15 = vadd.f32 %v297_v12, %v249_v60 }
 0x15f   :  { %v307_v17 = vpop.permute.xlu1 %306  ;;  %328 = vrot.lane.b32.xlu0 %v298_v15, %s595_s15  ;;  %332 = vrot.lane.b32.xlu1 %v304_v13, %s596_s16 }
 0x160   :  { %v309_v19 = vmul.f32 %v528_v58, %v307_v17 }
 0x162   :  { %v310_v21 = vadd.f32 %v309_v19, %v249_v60 }
 0x164   :  { %336 = vrot.lane.b32.xlu0 %v310_v21, %s597_s17  ;;  %v263_v23 = vpop.permute.xlu1 %262 }
 0x165   :  { %v265_v25 = vmul.f32 %v528_v58, %v263_v23 }
 0x167   :  { %v266_v27 = vadd.f32 %v265_v25, %v249_v60 }
 0x168   :  { %v317_v28 = vpop.permute.xlu1 %316 }
 0x1c8   :  { %v313_v26 = vpop.permute.xlu0 %312 }
 0x1c9   :  { %v340_v30 = vsel %vm339_vm0, %v266_v27, %v313_v26 }
 0x1ca   :  { %v342_v32 = vsel %vm341_vm1, %v340_v30, %v317_v28 }
 0x1cb   :  { %v344_v33 = vsel %vm343_vm2, %v342_v32, %v321_v24 }
 0x1cd   :  { %v325_v31 = vpop.permute.xlu1 %324 }
 0x1ce   :  { %v346_v5 = vsel %vm345_vm3, %v344_v33, %v325_v31 }
 0x1d1   :  { %v329_v34 = vpop.permute.xlu0 %328  ;;  %v333_v36 = vpop.permute.xlu1 %332 }
 0x1d2   :  { %v348_v35 = vsel %vm347_vm4, %v346_v5, %v329_v34 }
 0x1d3   :  { %v350_v37 = vsel %vm349_vm5, %v348_v35, %v333_v36 }
 0x1d6   :  { %v337_v38 = vpop.permute.xlu0 %336 }
 0x1d7   :  { %v650_v39 = vsel %vm351_vm6, %v350_v37, %v337_v38 }
 0x1d8   :  { %v356_v40 = vand.u32 2139095040, %v650_v39  ;;  %v353_v44 = vand.u32 2147483647, %v650_v39  ;;  %vm355_vm14 = vcmp.lt.s32.totalorder %v650_v39, 0  ;;  %vm445_vm3 = vweird.f32 %v650_v39 }
 0x1da   :  { %v357_v41 = vshrl.u32 %v356_v40, 23  ;;  %v360_v47 = vand.u32 8388607, %v353_v44  ;;  %vm354_vm15 = vcmp.le.f32.partialorder %v353_v44, 0.7853982 }
 0x1dc   :  { %v481_v42 = vadd.s32 4294967169, %v357_v41  ;;  %v361_v60 = vor.u32 8388608, %v360_v47 }
 0x1de   :  { %v363_v43 = vadd.s32 1, %v481_v42 }
 0x1e0   :  { %vm364_vm7 = vcmp.gt.s32.totalorder %v363_v43, 0 }
 0x1e1   :  { %v365_v45 = vsel %vm364_vm7, %v363_v43, 0 }
 0x1e2   :  { %v367_v46 = vand.u32 31, %v365_v45  ;;  %v366_v49 = vshrl.u32 %v365_v45, 5 }
 0x1e4   :  { %v368_v48 = vsub.s32 32, %v367_v46  ;;  %v370_v50 = vshll.u32 %v580_v14, %v367_v46  ;;  %v373_v51 = vshll.u32 %v581_v16, %v367_v46  ;;  %v376_v54 = vshll.u32 %v582_v18, %v367_v46 }
 0x1e5   :  { %v379_v56 = vshll.u32 %v583_v20, %v367_v46  ;;  %v382_v58 = vshll.u32 %v584_v22, %v367_v46  ;;  %vm385_vm8 = vcmp.lt.s32.totalorder %v366_v49, 1  ;;  %vm388_vm9 = vcmp.lt.s32.totalorder %v366_v49, 4 }
 0x1e6   :  { %v371_v52 = vshrl.u32 %v581_v16, %v368_v48  ;;  %v374_v53 = vshrl.u32 %v582_v18, %v368_v48  ;;  %v377_v55 = vshrl.u32 %v583_v20, %v368_v48  ;;  %v380_v57 = vshrl.u32 %v584_v22, %v368_v48 }
 0x1e7   :  { %v383_v59 = vshrl.u32 %v585_v29, %v368_v48  ;;  %v369_v4 = vshrl.u32 %v580_v14, %v368_v48  ;;  %vm387_vm10 = vcmp.lt.s32.totalorder %v366_v49, 3  ;;  %vm386_vm11 = vcmp.lt.s32.totalorder %v366_v49, 2 }
 0x1e8   :  { %v372_v61 = vor.u32 %v371_v52, %v370_v50  ;;  %v375_v62 = vor.u32 %v374_v53, %v373_v51  ;;  %v378_v63 = vor.u32 %v377_v55, %v376_v54  ;;  %v381_v0 = vor.u32 %v380_v57, %v379_v56 }
 0x1e9   :  { %v384_v16 = vor.u32 %v383_v59, %v382_v58  ;;  %v401_v29 = vshll.u32 %v361_v60, 8 }
 0x1ea   :  { %v390_v1 = vsel %vm388_vm9, %v378_v63, 2102212464  ;;  %v393_v18 = vsel %vm385_vm8, %v372_v61, %v375_v62  ;;  %v397_v3 = vsel %vm385_vm8, %v375_v62, %v378_v63  ;;  %v394_v20 = vsel %vm388_vm9, %v381_v0, 920167782 }
 0x1eb   :  { %v398_v6 = vsel %vm388_vm9, %v384_v16, 1326507024  ;;  %v395_v22 = vsel %vm387_vm10, %v378_v63, %v394_v20  ;;  %v389_v8 = vsel %vm385_vm8, %v369_v4, %v372_v61  ;;  %v391_v9 = vsel %vm387_vm10, %v375_v62, %v390_v1 }
 0x1ec   :  { %v399_v7 = vsel %vm387_vm10, %v381_v0, %v398_v6  ;;  %v396_v2 = vsel %vm386_vm11, %v393_v18, %v395_v22  ;;  %v392_v17 = vsel %vm386_vm11, %v389_v8, %v391_v9 }
 0x1ed   :  { %v400_v10 = vsel %vm386_vm11, %v397_v3, %v399_v7  ;;  %v670_v13 = vmul.u32.u64.low %v401_v29, %v396_v2  ;;  %v671_v15 = vmul.u32.u64.high %v401_v29, %v396_v2, %v670_v13  ;;  %v408_v19 = vmul.u32 %v401_v29, %v392_v17 }
 0x1ee   :  { %v667_v11 = vmul.u32.u64.low %v401_v29, %v400_v10  ;;  %v668_v12 = vmul.u32.u64.high %v401_v29, %v400_v10, %v667_v11 }
 0x1ef   :  { %v411_v14 = vadd.s32 1, %v671_v15 }
 0x1f0   :  { %vm410_vm12 = vc.u32 %v668_v12, %v670_v13  ;;  %v409_v34 = vadd.s32 %v670_v13, %v668_v12 }
 0x1f1   :  { %v412_v21 = vsel %vm410_vm12, %v411_v14, %v671_v15 }
 0x1f2   :  { %v413_v23 = vadd.s32 %v412_v21, %v408_v19 }
 0x1f4   :  { %v414_v24 = vadd.s32 536870912, %v413_v23 }
 0x1f6   :  { %v415_v25 = vshrl.u32 %v414_v24, 30 }
 0x1f8   :  { %v416_v26 = vshll.u32 %v415_v25, 30  ;;  %v439_v48 = vsub.s32 4, %v415_v25 }
 0x1fa   :  { %v417_v27 = vsub.s32 %v413_v23, %v416_v26  ;;  %v440_v51 = vsel %vm355_vm14, %v439_v48, %v415_v25 }
 0x1fb   :  { %v442_v52 = vsel %vm354_vm15, 0, %v440_v51 }
 0x1fc   :  { %v419_v28 = vsub.s32 0, %v417_v27  ;;  %v446_v53 = vadd.s32 3, %v442_v52 }
 0x1fe   :  { %v482_v30 = vmin.u32 %v419_v28, %v417_v27  ;;  %v447_v54 = vand.u32 3, %v446_v53 }
 0x200   :  { %v421_v31 = vclz %v482_v30  ;;  %vm452_vm0 = vcmp.eq.s32.totalorder %v447_v54, 2  ;;  %vm449_vm1 = vcmp.eq.s32.totalorder %v447_v54, 0  ;;  %vm448_vm2 = vcmp.lt.s32.totalorder %v447_v54, 2 }
 0x202   :  { %v483_v32 = vadd.s32 4294967294, %v421_v31 }
 0x204   :  { %vm484_vm13 = vcmp.lt.s32.totalorder %v483_v32, 0 }
 0x205   :  { %v424_v33 = vsel %vm484_vm13, 0, %v483_v32 }
 0x206   :  { %v425_v5 = vsub.s32 32, %v424_v33  ;;  %v429_v35 = vsub.s32 4294967266, %v424_v33  ;;  %v426_v36 = vshll.u32 %v417_v27, %v424_v33 }
 0x208   :  { %v427_v37 = vshrl.u32 %v409_v34, %v425_v5  ;;  %v430_v38 = vadd.s32 127, %v429_v35 }
 0x20a   :  { %v428_v40 = vor.u32 %v427_v37, %v426_v36  ;;  %v431_v41 = vshll.u32 %v430_v38, 23 }
 0x20c   :  { %v432_v42 = vor.u32 4788187, %v431_v41  ;;  %v435_v45 = vcvt.s32.f32 %v428_v40 }
 0x20e   :  { %v433_v43 = vand.u32 2147483647, %v432_v42 }
 0x210   :  { %v436_v46 = vmul.f32 %v435_v45, %v433_v43 }
 0x212   :  { %v437_v47 = vxor.u32 2147483648, %v436_v46 }
 0x214   :  { %v438_v49 = vsel %vm355_vm14, %v437_v47, %v436_v46 }
 0x215   :  { %v441_v50 = vsel %vm354_vm15, %v650_v39, %v438_v49 }
 0x216   :  { %529 = vcosq.f32 %v441_v50 }
 0x217   :  { %531 = vsinq.f32 %v441_v50 }
 0x223   :  { %v530_v55 = vpop.eup %529 }
 0x224   :  { %v532_v56 = vpop.eup %531  ;;  %v453_v57 = vxor.u32 2147483648, %v530_v55 }
 0x225   :  { %v450_v58 = vxor.u32 2147483648, %v532_v56 }
 0x226   :  { %v454_v59 = vsel %vm452_vm0, %v453_v57, %v532_v56 }
 0x227   :  { %v451_v44 = vsel %vm449_vm1, %v530_v55, %v450_v58 }
 0x228   :  { %v455_v60 = vsel %vm448_vm2, %v451_v44, %v454_v59 }
 0x229   :  { %v456_v61 = vsel %vm445_vm3, nan, %v455_v60 }
 0x22a   :  { %457 = vst [vmem:[#allocation5] sm:$0xff] %v456_v61 }
 0x22b   :  { %564 = shalt.err (!%p561_p9)
}
 0x22c   :  { %467 = dma.vmem_to_hbm [thread:$0]  %s465_s19, 128, %s686_s1, [#allocation4]  }
 0x22d   :  { %575 = dma.done.wait [#allocation4], 128  }
 0x22e   :  { %576 = vsyncadd [#allocation4], 4294967168 }
 0x22f   :  { %471 = vsyncpa [#allocation3], 1 }
 0x230   :  { %472 = vsyncpa [#allocation4], 1 }

</bundles_post_ra>
